<compile_context>
chip_gen: v6e
topology: v6e:2x2x1
jax: 0.10.0
libtpu: 0.0.40
codegen_flags: <defaults>
</compile_context>

<pallas_src>
import functools

import jax
import jax.numpy as jnp
from jax.experimental import pallas as pl
from jax.experimental.pallas import tpu as pltpu


def _round_up(x, m):
    return (x + m - 1) // m * m


def _fc_kernel(x_ref, w_ref, b_ref, out_ref, *, precision):
    """One (tb, tn) output tile: logits = x @ W' + b'  (BIC alpha/beta pre-folded)."""
    acc = jnp.dot(x_ref[...], w_ref[...],
                  preferred_element_type=jnp.float32, precision=precision)
    out_ref[...] = (acc + b_ref[...]).astype(out_ref.dtype)


def prepare_fc_params(fc_weight, fc_bias, task_alphas=None, task_betas=None,
                      task_sizes=None, bias_correction=False, param_dtype=None):
    """Hoisted preprocessing (runs once per task increment, NOT per forward).

      * fold the sequential BiasLayer_BIC corrections into W / b (class ranges
        are disjoint, so the fold is exact)
      * pad the class dim to a multiple of 128 (lane-dense output stores)
      * transpose once to [feat_dim, cls_p] for a clean MXU matmul

    Returns (w_t [feat_dim, cls_p], bias_row [1, cls_p] f32, nb_classes).
    """
    nb_classes, feat_dim = fc_weight.shape
    if param_dtype is None:
        param_dtype = fc_weight.dtype

    w = jnp.asarray(fc_weight, jnp.float32)
    b = jnp.asarray(fc_bias, jnp.float32)
    if bias_correction:
        assert task_sizes is not None
        alpha_vec = jnp.ones((nb_classes,), jnp.float32)
        beta_vec = jnp.zeros((nb_classes,), jnp.float32)
        for i, ts in enumerate(task_sizes):
            lo = int(sum(task_sizes[:i]))
            hi = lo + int(ts)
            alpha_vec = alpha_vec.at[lo:hi].set(jnp.asarray(task_alphas[i], jnp.float32))
            beta_vec = beta_vec.at[lo:hi].set(jnp.asarray(task_betas[i], jnp.float32))
        w = w * alpha_vec[:, None]          # W' = alpha_c * W   (per-class rows)
        b = alpha_vec * b + beta_vec        # b' = alpha_c * b + beta_c

    cls_p = _round_up(nb_classes, 128)
    w_t = jnp.pad(w, ((0, cls_p - nb_classes), (0, 0))).T.astype(param_dtype)
    bias_row = jnp.pad(b, (0, cls_p - nb_classes)).reshape(1, cls_p)  # keep f32
    return w_t, bias_row, nb_classes


def incremental_net_with_bias_forward(features, w_t, bias_row, nb_classes,
                                      block_b=512, block_n=None, out_dtype=None):
    """logits = features @ W'^T + b'  (== fc + BiasLayer_BIC chain of the module).

    features: [B, feat_dim]  pre-extracted backbone features (f32 or bf16)
    w_t:      [feat_dim, cls_p]  prepared by prepare_fc_params
    bias_row: [1, cls_p] f32     prepared by prepare_fc_params
    returns:  logits [B, nb_classes]
    """
    feat_dim, cls_p = w_t.shape
    B, fd = features.shape
    assert fd == feat_dim, (fd, feat_dim)

    compute_dtype = w_t.dtype
    if features.dtype != compute_dtype:
        features = features.astype(compute_dtype)
    if out_dtype is None:
        out_dtype = compute_dtype
    itemsize = jnp.dtype(compute_dtype).itemsize
    out_itemsize = jnp.dtype(out_dtype).itemsize
    sublane = 8 * (4 // itemsize)          # 8 for f32, 16 for bf16

    # Batch tiling: even split so padding is at most one sublane tile per tile.
    n_b_tiles = max(1, pl.cdiv(B, block_b))
    tb = _round_up(pl.cdiv(B, n_b_tiles), sublane)
    b_p = n_b_tiles * tb
    x_in = features if b_p == B else jnp.pad(features, ((0, b_p - B), (0, 0)))

    # Class tiling: lane-dense multiple of 128 that divides cls_p.
    if block_n is None:
        block_n = 1024 * (4 // itemsize)   # 1024 f32 / 2048 bf16
    tn = max(128, min(cls_p, block_n))
    tn = (tn // 128) * 128
    while cls_p % tn:
        tn -= 128
    n_cls_tiles = cls_p // tn

    # VMEM budget: double-buffered x/out tiles, W tile (single-buffered if
    # block-constant), bias row.  Clamp to ~70% of the device's VMEM capacity.
    w_bufs = 1 if n_cls_tiles == 1 else 2
    bytes_est = (2 * tb * feat_dim * itemsize
                 + w_bufs * feat_dim * tn * itemsize
                 + 2 * tn * 4
                 + 2 * tb * tn * out_itemsize)
    vmem_cap = 64 * 2 ** 20                # conservative default (v7x)
    try:
        vmem_cap = pltpu.get_tpu_info().vmem_capacity_bytes
    except Exception:
        pass
    vmem_limit = int(min(max(2 * bytes_est, 8 * 2 ** 20), int(0.7 * vmem_cap)))

    precision = (jax.lax.Precision.HIGHEST if compute_dtype == jnp.float32
                 else jax.lax.Precision.DEFAULT)
    kernel = functools.partial(_fc_kernel, precision=precision)

    cost = pl.CostEstimate(
        flops=2 * b_p * feat_dim * cls_p,
        transcendentals=0,
        bytes_accessed=(b_p * feat_dim * itemsize + feat_dim * cls_p * itemsize
                        + cls_p * 4 + b_p * cls_p * out_itemsize))

    def _call(single_buffer_consts):
        def const_spec(shape, index_map):
            if single_buffer_consts:
                return pl.BlockSpec(shape, index_map, pipeline_mode=pl.Buffered(1))
            return pl.BlockSpec(shape, index_map)

        return pl.pallas_call(
            kernel,
            out_shape=jax.ShapeDtypeStruct((b_p, cls_p), out_dtype),
            grid=(n_b_tiles, n_cls_tiles),
            in_specs=[
                pl.BlockSpec((tb, feat_dim), lambda i, j: (i, 0)),   # x tile (pipelined)
                const_spec((feat_dim, tn), lambda i, j: (0, j)),     # W'^T tile
                const_spec((1, tn), lambda i, j: (0, j)),            # bias row (f32)
            ],
            out_specs=pl.BlockSpec((tb, tn), lambda i, j: (i, j)),
            compiler_params=pltpu.CompilerParams(
                dimension_semantics=("parallel", "parallel"),
                vmem_limit_bytes=vmem_limit),
            cost_estimate=cost,
        )(x_in, w_t, bias_row)

    try:
        # single-buffer W/bias only when they are truly block-constant
        out_padded = _call(n_cls_tiles == 1)
    except Exception:
        # fallback if pipeline_mode / pl.Buffered is unavailable in this JAX
        out_padded = _call(False)

    return out_padded[:B, :nb_classes]


def _reference_forward(features, fc_weight, fc_bias, task_alphas=None,
                       task_betas=None, task_sizes=None, bias_correction=False):
    """Pure-JAX mirror of IncrementalNetWithBias.forward (fc + BiasLayer_BIC chain)."""
    logits = (features.astype(jnp.float32) @ fc_weight.astype(jnp.float32).T
              + fc_bias.astype(jnp.float32))
    if bias_correction:
        for i, ts in enumerate(task_sizes):
            lo = int(sum(task_sizes[:i]))
            hi = lo + int(ts)
            logits = logits.at[:, lo:hi].set(
                task_alphas[i] * logits[:, lo:hi] + task_betas[i])
    return logits


if __name__ == "__main__":
    key = jax.random.PRNGKey(0)
    k1, k2, k3, k4, k5 = jax.random.split(key, 5)

    # Small shapes consistent with the module: pre-extracted features + an
    # incrementally-grown fc head with one BiasLayer_BIC per task.
    B = 8                      # batch of feature vectors
    feat_dim = 64              # backbone out_dim (512 for resnet18 in practice)
    task_sizes = [10, 10, 10]  # three incremental tasks
    nb_classes = sum(task_sizes)

    features = jax.random.normal(k1, (B, feat_dim), dtype=jnp.float32)
    fc_w = 0.1 * jax.random.normal(k2, (nb_classes, feat_dim), dtype=jnp.float32)
    fc_b = 0.01 * jax.random.normal(k3, (nb_classes,), dtype=jnp.float32)
    alphas = 1.0 + 0.1 * jax.random.normal(k4, (len(task_sizes),), dtype=jnp.float32)
    betas = 0.05 * jax.random.normal(k5, (len(task_sizes),), dtype=jnp.float32)

    # --- f32 path, with BIC bias correction (alpha/beta folded into W'/b' once) ---
    w_t, b_row, ncls = prepare_fc_params(
        fc_w, fc_b, task_alphas=alphas, task_betas=betas,
        task_sizes=task_sizes, bias_correction=True)
    logits = incremental_net_with_bias_forward(features, w_t, b_row, ncls)
    jax.block_until_ready(logits)
    ref = _reference_forward(features, fc_w, fc_b, task_alphas=alphas,
                             task_betas=betas, task_sizes=task_sizes,
                             bias_correction=True)
    assert logits.shape == (B, nb_classes)
    assert jnp.allclose(logits, ref, atol=1e-3, rtol=1e-3), \
        float(jnp.max(jnp.abs(logits - ref)))

    # --- f32 path, no bias correction (plain fc forward) ---
    w_t0, b_row0, ncls0 = prepare_fc_params(fc_w, fc_b, bias_correction=False)
    logits_nb = incremental_net_with_bias_forward(features, w_t0, b_row0, ncls0)
    jax.block_until_ready(logits_nb)
    ref_nb = _reference_forward(features, fc_w, fc_b, bias_correction=False)
    assert jnp.allclose(logits_nb, ref_nb, atol=1e-3, rtol=1e-3)

    # --- bf16 path (recommended deployment dtype), odd batch -> sublane padding ---
    B2 = 6
    feats_bf16 = jax.random.normal(jax.random.PRNGKey(7), (B2, feat_dim),
                                   dtype=jnp.bfloat16)
    w_t16, b_row16, ncls16 = prepare_fc_params(
        fc_w, fc_b, task_alphas=alphas, task_betas=betas, task_sizes=task_sizes,
        bias_correction=True, param_dtype=jnp.bfloat16)
    logits16 = incremental_net_with_bias_forward(feats_bf16, w_t16, b_row16, ncls16)
    jax.block_until_ready(logits16)
    ref16 = _reference_forward(feats_bf16.astype(jnp.float32), fc_w, fc_b,
                               task_alphas=alphas, task_betas=betas,
                               task_sizes=task_sizes, bias_correction=True)
    assert logits16.shape == (B2, nb_classes)
    assert jnp.allclose(logits16.astype(jnp.float32), ref16, atol=5e-2, rtol=5e-2)

    print("KERNEL_OK")
</pallas_src>

<mosaic_0001>
module attributes {stable_mosaic.version = 11 : i64} {
  func.func @_fc_kernel(%arg0: i32, %arg1: i32, %arg2: memref<8x64xf32, #tpu.memory_space<vmem>>, %arg3: memref<64x128xf32, #tpu.memory_space<vmem>>, %arg4: memref<1x128xf32, #tpu.memory_space<vmem>>, %arg5: memref<8x128xf32, #tpu.memory_space<vmem>>) attributes {dimension_semantics = [#tpu.dimension_semantics<parallel>, #tpu.dimension_semantics<parallel>], iteration_bounds = array<i64: 1, 1>, scalar_prefetch = 0 : i64, scratch_operands = 0 : i64, tpu.core_type = #tpu.core_type<tc>, window_params = [{transform_indices = @transform_0, window_bounds = array<i64: 8, 64>}, {pipeline_mode = #tpu.pipeline_mode<synchronous>, transform_indices = @transform_1, window_bounds = array<i64: 64, 128>}, {pipeline_mode = #tpu.pipeline_mode<synchronous>, transform_indices = @transform_2, window_bounds = array<i64: 1, 128>}, {transform_indices = @transform_3, window_bounds = array<i64: 8, 128>}]} {
    %c0 = arith.constant 0 : index
    %c0_0 = arith.constant 0 : index
    %0 = vector.load %arg2[%c0, %c0_0] : memref<8x64xf32, #tpu.memory_space<vmem>>, vector<8x64xf32>
    %c0_1 = arith.constant 0 : index
    %c0_2 = arith.constant 0 : index
    %1 = vector.load %arg3[%c0_1, %c0_2] : memref<64x128xf32, #tpu.memory_space<vmem>>, vector<64x128xf32>
    %cst = arith.constant dense<0.000000e+00> : vector<8x128xf32>
    %2 = tpu.matmul %0, %1, %cst {dimension_numbers = #tpu.dot_dimension_numbers<[1], [0], [0], [1], [0, 0, 1, 1], [], []>, precision = #tpu.contract_precision<fp32>} : vector<8x64xf32>, vector<64x128xf32>, vector<8x128xf32> -> vector<8x128xf32>
    %c0_3 = arith.constant 0 : index
    %c0_4 = arith.constant 0 : index
    %3 = vector.load %arg4[%c0_3, %c0_4] : memref<1x128xf32, #tpu.memory_space<vmem>>, vector<1x128xf32>
    %4 = vector.broadcast %3 : vector<1x128xf32> to vector<8x128xf32>
    %5 = arith.addf %2, %4 : vector<8x128xf32>
    %c0_5 = arith.constant 0 : index
    %c0_6 = arith.constant 0 : index
    %6 = vector.load %arg5[%c0_5, %c0_6] : memref<8x128xf32, #tpu.memory_space<vmem>>, vector<8x128xf32>
    tpu.vector_store %arg5[%c0_5, %c0_6], %5 {strides = array<i32>} : memref<8x128xf32, #tpu.memory_space<vmem>>, vector<8x128xf32>,
    return
  }
  func.func @transform_0(%arg0: i32, %arg1: i32) -> (i32, i32) {
    %c0_i32 = arith.constant 0 : i32
    %c0_i32_0 = arith.constant 0 : i32
    return %arg0, %c0_i32 : i32, i32
  }
  func.func @transform_1(%arg0: i32, %arg1: i32) -> (i32, i32) {
    %c0_i32 = arith.constant 0 : i32
    %c0_i32_0 = arith.constant 0 : i32
    return %c0_i32, %arg1 : i32, i32
  }
  func.func @transform_2(%arg0: i32, %arg1: i32) -> (i32, i32) {
    %c0_i32 = arith.constant 0 : i32
    %c0_i32_0 = arith.constant 0 : i32
    return %c0_i32, %arg1 : i32, i32
  }
  func.func @transform_3(%arg0: i32, %arg1: i32) -> (i32, i32) {
    %c0_i32 = arith.constant 0 : i32
    return %arg0, %arg1 : i32, i32
  }
}

module attributes {stable_mosaic.version = 11 : i64} {
  func.func @_fc_kernel(%arg0: i32, %arg1: i32, %arg2: memref<8x64xf32, #tpu.memory_space<vmem>>, %arg3: memref<64x128xf32, #tpu.memory_space<vmem>>, %arg4: memref<1x128xf32, #tpu.memory_space<vmem>>, %arg5: memref<8x128xf32, #tpu.memory_space<vmem>>) attributes {dimension_semantics = [#tpu.dimension_semantics<parallel>, #tpu.dimension_semantics<parallel>], iteration_bounds = array<i64: 1, 1>, scalar_prefetch = 0 : i64, scratch_operands = 0 : i64, tpu.core_type = #tpu.core_type<tc>, window_params = [{transform_indices = @transform_0, window_bounds = array<i64: 8, 64>}, {transform_indices = @transform_1, window_bounds = array<i64: 64, 128>}, {transform_indices = @transform_2, window_bounds = array<i64: 1, 128>}, {transform_indices = @transform_3, window_bounds = array<i64: 8, 128>}]} {
    %c0 = arith.constant 0 : index
    %c0_0 = arith.constant 0 : index
    %0 = vector.load %arg2[%c0, %c0_0] : memref<8x64xf32, #tpu.memory_space<vmem>>, vector<8x64xf32>
    %c0_1 = arith.constant 0 : index
    %c0_2 = arith.constant 0 : index
    %1 = vector.load %arg3[%c0_1, %c0_2] : memref<64x128xf32, #tpu.memory_space<vmem>>, vector<64x128xf32>
    %cst = arith.constant dense<0.000000e+00> : vector<8x128xf32>
    %2 = tpu.matmul %0, %1, %cst {dimension_numbers = #tpu.dot_dimension_numbers<[1], [0], [0], [1], [0, 0, 1, 1], [], []>, precision = #tpu.contract_precision<fp32>} : vector<8x64xf32>, vector<64x128xf32>, vector<8x128xf32> -> vector<8x128xf32>
    %c0_3 = arith.constant 0 : index
    %c0_4 = arith.constant 0 : index
    %3 = vector.load %arg4[%c0_3, %c0_4] : memref<1x128xf32, #tpu.memory_space<vmem>>, vector<1x128xf32>
    %4 = vector.broadcast %3 : vector<1x128xf32> to vector<8x128xf32>
    %5 = arith.addf %2, %4 : vector<8x128xf32>
    %c0_5 = arith.constant 0 : index
    %c0_6 = arith.constant 0 : index
    %6 = vector.load %arg5[%c0_5, %c0_6] : memref<8x128xf32, #tpu.memory_space<vmem>>, vector<8x128xf32>
    tpu.vector_store %arg5[%c0_5, %c0_6], %5 {strides = array<i32>} : memref<8x128xf32, #tpu.memory_space<vmem>>, vector<8x128xf32>,
    return
  }
  func.func @transform_0(%arg0: i32, %arg1: i32) -> (i32, i32) {
    %c0_i32 = arith.constant 0 : i32
    %c0_i32_0 = arith.constant 0 : i32
    return %arg0, %c0_i32 : i32, i32
  }
  func.func @transform_1(%arg0: i32, %arg1: i32) -> (i32, i32) {
    %c0_i32 = arith.constant 0 : i32
    %c0_i32_0 = arith.constant 0 : i32
    return %c0_i32, %arg1 : i32, i32
  }
  func.func @transform_2(%arg0: i32, %arg1: i32) -> (i32, i32) {
    %c0_i32 = arith.constant 0 : i32
    %c0_i32_0 = arith.constant 0 : i32
    return %c0_i32, %arg1 : i32, i32
  }
  func.func @transform_3(%arg0: i32, %arg1: i32) -> (i32, i32) {
    %c0_i32 = arith.constant 0 : i32
    return %arg0, %arg1 : i32, i32
  }
}

</mosaic_0001>

<bundles_post_ra>
// kernel: tpu_custom_call.1
= control target key start
LH: loop header
LB: loop body
LE: loop exit
PB: predicated region body
PF: predicated region fallthrough
CT: control target
= control target key end

     0   :  { %8 = vsyncpa [#allocation3], 0  ;;  %s1092_s0 = inlined_call_operand.hbm [shape: f32[8,64], index: 0, kind: input, shape index: {}]   ;;  %s1093_s1 = inlined_call_operand.hbm [shape: f32[64,128], index: 1, kind: input, shape index: {}]   ;;  %s1094_s2 = inlined_call_operand.vmem [shape: f32[1,128], index: 2, kind: input, shape index: {}]   ;;  %s1095_s3 = inlined_call_operand.hbm [shape: f32[8,128], index: 3, kind: output, shape index: {}]  }
   0x1   :  { %9 = vsyncpa [#allocation6], 0 }
   0x2   :  { %10 = vsyncpa [#allocation4], 0  ;;  %s857_s12 = smov [#allocation2]   ;;  %s858_s14 = smov [#allocation5]  }
   0x3   :  { %s17_s13 = sshll.u32 %s857_s12, 4  ;;  %s26_s15 = sshll.u32 %s858_s14, 4  ;;  %s18_s13 = int_to_ptr.vmem [resolvable:$true] %s17_s13  ;;  %s27_s15 = int_to_ptr.vmem [resolvable:$true] %s26_s15 }
   0x4   :  { %s799_s16 = scalar_lea.vmem %s18_s13, 128  ;;  %p804_p1 = scmp.lt.s32.totalorder %s18_s13, %s18_s13 }
   0x5   :  { %p800_p0 = scmp.ne.s32.totalorder %s18_s13, %s799_s16  ;;  %p805_p2 = scmp.lt.s32.totalorder %s799_s16, %s799_s16 }
   0x7   :  { %p806_p3 = por %p805_p2, %p804_p1 }
   0x9   :  { %p807_p4 = pnand %p806_p3, %p800_p0 }
   0xb   :  { %810 = shalt.err (!%p807_p4)
}
   0xc   :  { %20 = dma.hbm_to_vmem [thread:$0]  %s1092_s0, 128, %s18_s13, [#allocation3]  }
   0xd   :  { %s819_s19 = scalar_lea.vmem %s27_s15, 1024  ;;  %p824_p6 = scmp.lt.s32.totalorder %s27_s15, %s27_s15 }
   0xe   :  { %p820_p5 = scmp.ne.s32.totalorder %s27_s15, %s819_s19  ;;  %p825_p7 = scmp.lt.s32.totalorder %s819_s19, %s819_s19 }
  0x10   :  { %p826_p8 = por %p825_p7, %p824_p6 }
  0x12   :  { %p827_p9 = pnand %p826_p8, %p820_p5 }
  0x14   :  { %830 = shalt.err (!%p827_p9)
}
  0x15   :  { %s859_s20 = smov 128   ;;  %s860_s21 = smov 8  }
  0x16   :  { %32 = dma.hbm_to_vmem [thread:$0]  %s1093_s1, 1024, %s27_s15, [#allocation6], %s859_s20, %s859_s20, %s860_s21  }
  0x17   :  { %851 = dma.done.wait [#allocation3], 128  }
  0x18   :  { %852 = vsyncadd [#allocation3], 4294967168 }
  0x19   :  { %853 = dma.done.wait [#allocation6], 1024  }
  0x1a   :  { %854 = vsyncadd [#allocation6], 4294966272  ;;  %v861_v0 = vmov 0.0   ;;  %vm862_vm0 = vmmov 0   ;;  %v49_v1 = vld [vmem:[#allocation5 + $0x38] sm:$0xff]  ;;  %v48_v2 = vld [vmem:[#allocation5 + $0x30] sm:$0xff] }
  0x1b   :  { %670 = vmatprep.subr.mxu0 %v861_v0  ;;  %689 = vmatprep.subr.mxu1 %v861_v0  ;;  %v47_v3 = vld [vmem:[#allocation5 + $0x28] sm:$0xff]  ;;  %vm57_vm1 = vcmask 523264   ;;  %v896_v4 = vand.u32 4294901760, %v49_v1  ;;  %v898_v5 = vand.u32 4294901760, %v48_v2  ;;  %v46_v7 = vld [vmem:[#allocation5 + $0x20] sm:$0xff]  ;;  %v45_v8 = vld [vmem:[#allocation5 + $0x18] sm:$0xff] }
  0x1c   :  { %686 = vmatprep.mubr.msk.f32.mxu0 %vm862_vm0, %v861_v0  ;;  %705 = vmatprep.mubr.msk.f32.mxu1 %vm862_vm0, %v861_v0  ;;  %v900_v6 = vand.u32 4294901760, %v47_v3  ;;  %v44_v9 = vld [vmem:[#allocation5 + $0x10] sm:$0xff]  ;;  %v902_v10 = vand.u32 4294901760, %v46_v7  ;;  %v904_v11 = vand.u32 4294901760, %v45_v8  ;;  %v43_v13 = vld [vmem:[#allocation5 + $0x8] sm:$0xff]  ;;  %v42_v14 = vld [vmem:[#allocation5] sm:$0xff] }
  0x1d   :  { %v906_v12 = vand.u32 4294901760, %v44_v9  ;;  %v41_v15 = vld [vmem:[#allocation2] sm:$0xff]  ;;  %671 = vmatpush3.msra.mxu0 %v896_v4  ;;  %v910_v16 = vsub.f32 %v49_v1, %v896_v4  ;;  %v913_v17 = vsub.f32 %v48_v2, %v898_v5  ;;  %v915_v18 = vand.u32 4294901760, %v43_v13  ;;  %s863_s24 = smov [#allocation7]  }
  0x1e   :  { %v918_v19 = vsub.f32 %v47_v3, %v900_v6  ;;  %672 = vmatprep.subr.mxu0 %v861_v0  ;;  %v921_v20 = vand.u32 4294901760, %v42_v14  ;;  %v924_v21 = vsub.f32 %v46_v7, %v902_v10  ;;  %v59_v22 = vsel %vm57_vm1, %v41_v15, 0  ;;  %v615_v1 = vld [vmem:[%s1094_s2] ss:$0 sm:$0xff]  ;;  %s605_s25 = sshll.u32 %s863_s24, 4  ;;  %s606_s25 = int_to_ptr.vmem [resolvable:$true] %s605_s25 }
  0x1f   :  { %v928_v23 = vsub.f32 %v45_v8, %v904_v11  ;;  %673 = vmatpush3.msra.mxu0 %v898_v5  ;;  %v163_v24 = vand.u32 4294901760, %v910_v16  ;;  %v170_v25 = vand.u32 4294901760, %v913_v17  ;;  %v934_v27 = vand.u32 4294901760, %v59_v22  ;;  %s831_s26 = scalar_lea.vmem %s606_s25, 128  ;;  %p836_p11 = scmp.lt.s32.totalorder %s606_s25, %s606_s25 }
  0x20   :  { %v177_v26 = vand.u32 4294901760, %v918_v19  ;;  %674 = vmatprep.subr.mxu0 %v861_v0  ;;  %v184_v28 = vand.u32 4294901760, %v924_v21  ;;  %v940_v30 = vsub.f32 %v44_v9, %v906_v12  ;;  %v943_v31 = vsub.f32 %v43_v13, %v915_v18  ;;  %p832_p10 = scmp.ne.s32.totalorder %s606_s25, %s831_s26  ;;  %p837_p12 = scmp.lt.s32.totalorder %s831_s26, %s831_s26 }
  0x21   :  { %v191_v29 = vand.u32 4294901760, %v928_v23  ;;  %675 = vmatpush3.msra.mxu0 %v900_v6  ;;  %v164_v32 = vsub.f32 %v910_v16, %v163_v24  ;;  %v171_v33 = vsub.f32 %v913_v17, %v170_v25  ;;  %v956_v35 = vsub.f32 %v59_v22, %v934_v27 }
  0x22   :  { %v178_v34 = vsub.f32 %v918_v19, %v177_v26  ;;  %676 = vmatprep.subr.mxu0 %v861_v0  ;;  %v185_v36 = vsub.f32 %v924_v21, %v184_v28  ;;  %v198_v40 = vand.u32 4294901760, %v940_v30  ;;  %v205_v44 = vand.u32 4294901760, %v943_v31  ;;  %p838_p13 = por %p837_p12, %p836_p11 }
  0x23   :  { %677 = vmatpush3.msra.mxu0 %v902_v10  ;;  %v165_v37 = vand.u32 4294901760, %v164_v32  ;;  %v172_v38 = vand.u32 4294901760, %v171_v33  ;;  %v136_v39 = vand.u32 4294901760, %v956_v35  ;;  %v192_v41 = vsub.f32 %v928_v23, %v191_v29 }
  0x24   :  { %678 = vmatprep.subr.mxu0 %v861_v0  ;;  %v179_v42 = vand.u32 4294901760, %v178_v34  ;;  %v975_v45 = vsub.f32 %v42_v14, %v921_v20  ;;  %v186_v46 = vand.u32 4294901760, %v185_v36  ;;  %v199_v47 = vsub.f32 %v940_v30, %v198_v40  ;;  %p839_p0 = pnand %p838_p13, %p832_p10 }
  0x25   :  { %679 = vmatpush3.msra.mxu0 %v904_v11  ;;  %690 = vmatpush3.msra.mxu1 %v165_v37  ;;  %v137_v43 = vsub.f32 %v956_v35, %v136_v39  ;;  %v193_v50 = vand.u32 4294901760, %v192_v41  ;;  %v206_v51 = vsub.f32 %v943_v31, %v205_v44 }
  0x26   :  { %680 = vmatprep.subr.mxu0 %v861_v0  ;;  %691 = vmatprep.subr.mxu1 %v861_v0  ;;  %v212_v48 = vand.u32 4294901760, %v975_v45  ;;  %v200_v52 = vand.u32 4294901760, %v199_v47 }
  0x27   :  { %681 = vmatpush3.msra.mxu0 %v906_v12  ;;  %692 = vmatpush3.msra.mxu1 %v172_v38  ;;  %v138_v49 = vand.u32 4294901760, %v137_v43  ;;  %v207_v54 = vand.u32 4294901760, %v206_v51 }
  0x28   :  { %682 = vmatprep.subr.mxu0 %v861_v0  ;;  %693 = vmatprep.subr.mxu1 %v861_v0  ;;  %v213_v53 = vsub.f32 %v975_v45, %v212_v48 }
  0x29   :  { %683 = vmatpush3.msra.mxu0 %v915_v18  ;;  %694 = vmatpush3.msra.mxu1 %v179_v42 }
  0x2a   :  { %684 = vmatprep.subr.mxu0 %v861_v0  ;;  %695 = vmatprep.subr.mxu1 %v861_v0  ;;  %v214_v55 = vand.u32 4294901760, %v213_v53 }
  0x2b   :  { %685 = vmatpush3.msra.mxu0 %v921_v20  ;;  %696 = vmatpush3.msra.mxu1 %v186_v46 }
  0x2c   :  { %697 = vmatprep.subr.mxu1 %v861_v0  ;;  %708 = vmatprep.subr.mxu0 %v861_v0 }
  0x2d   :  { %687 = vmatmul.mubr.f32.vlgmr.msra.gmra.mxu0 %v138_v49  ;;  %698 = vmatpush3.msra.mxu1 %v193_v50 }
  0x2e   :  { %709 = vmatpush3.msra.mxu0 %v910_v16  ;;  %699 = vmatprep.subr.mxu1 %v861_v0 }
  0x2f   :  { %710 = vmatprep.subr.mxu0 %v861_v0  ;;  %700 = vmatpush3.msra.mxu1 %v200_v52 }
  0x30   :  { %711 = vmatpush3.msra.mxu0 %v913_v17  ;;  %701 = vmatprep.subr.mxu1 %v861_v0 }
  0x31   :  { %712 = vmatprep.subr.mxu0 %v861_v0  ;;  %702 = vmatpush3.msra.mxu1 %v207_v54 }
  0x32   :  { %713 = vmatpush3.msra.mxu0 %v918_v19  ;;  %703 = vmatprep.subr.mxu1 %v861_v0 }
  0x33   :  { %714 = vmatprep.subr.mxu0 %v861_v0  ;;  %704 = vmatpush3.msra.mxu1 %v214_v55 }
  0x34   :  { %715 = vmatpush3.msra.mxu0 %v924_v21  ;;  %706 = vmatmul.mubr.f32.vlgmr.msra.gmra.mxu1 %v934_v27 }
  0x35   :  { %716 = vmatprep.subr.mxu0 %v861_v0  ;;  %727 = vmatprep.subr.mxu1 %v861_v0 }
  0x36   :  { %717 = vmatpush3.msra.mxu0 %v928_v23  ;;  %728 = vmatpush3.msra.mxu1 %v896_v4 }
  0x37   :  { %718 = vmatprep.subr.mxu0 %v861_v0  ;;  %729 = vmatprep.subr.mxu1 %v861_v0 }
  0x38   :  { %719 = vmatpush3.msra.mxu0 %v940_v30  ;;  %730 = vmatpush3.msra.mxu1 %v898_v5 }
  0x39   :  { %720 = vmatprep.subr.mxu0 %v861_v0  ;;  %731 = vmatprep.subr.mxu1 %v861_v0 }
  0x3a   :  { %721 = vmatpush3.msra.mxu0 %v943_v31  ;;  %732 = vmatpush3.msra.mxu1 %v900_v6 }
  0x3b   :  { %722 = vmatprep.subr.mxu0 %v861_v0  ;;  %733 = vmatprep.subr.mxu1 %v861_v0 }
  0x3c   :  { %723 = vmatpush3.msra.mxu0 %v975_v45  ;;  %724 = vmatprep.mubr.msk.f32.mxu0 %vm862_vm0, %v861_v0 }
  0x3d   :  { %734 = vmatpush3.msra.mxu1 %v902_v10  ;;  %725 = vmatmul.mubr.f32.vlgmr.msra.gmra.mxu0 %v956_v35 }
  0x3e   :  { %735 = vmatprep.subr.mxu1 %v861_v0  ;;  %746 = vmatprep.subr.mxu0 %v861_v0 }
  0x3f   :  { %736 = vmatpush3.msra.mxu1 %v904_v11  ;;  %747 = vmatpush3.msra.mxu0 %v163_v24 }
  0x40   :  { %737 = vmatprep.subr.mxu1 %v861_v0  ;;  %748 = vmatprep.subr.mxu0 %v861_v0 }
  0x41   :  { %738 = vmatpush3.msra.mxu1 %v906_v12  ;;  %749 = vmatpush3.msra.mxu0 %v170_v25 }
  0x42   :  { %739 = vmatprep.subr.mxu1 %v861_v0  ;;  %750 = vmatprep.subr.mxu0 %v861_v0 }
  0x43   :  { %740 = vmatpush3.msra.mxu1 %v915_v18  ;;  %751 = vmatpush3.msra.mxu0 %v177_v26 }
  0x44   :  { %741 = vmatprep.subr.mxu1 %v861_v0  ;;  %752 = vmatprep.subr.mxu0 %v861_v0 }
  0x45   :  { %742 = vmatpush3.msra.mxu1 %v921_v20  ;;  %743 = vmatprep.mubr.msk.f32.mxu1 %vm862_vm0, %v861_v0 }
  0x46   :  { %753 = vmatpush3.msra.mxu0 %v184_v28  ;;  %744 = vmatmul.mubr.f32.vlgmr.msra.gmra.mxu1 %v136_v39 }
  0x47   :  { %754 = vmatprep.subr.mxu0 %v861_v0  ;;  %765 = vmatprep.subr.mxu1 %v861_v0 }
  0x48   :  { %755 = vmatpush3.msra.mxu0 %v191_v29  ;;  %766 = vmatpush3.msra.mxu1 %v896_v4 }
  0x49   :  { %756 = vmatprep.subr.mxu0 %v861_v0  ;;  %767 = vmatprep.subr.mxu1 %v861_v0 }
  0x4a   :  { %757 = vmatpush3.msra.mxu0 %v198_v40  ;;  %768 = vmatpush3.msra.mxu1 %v898_v5 }
  0x4b   :  { %758 = vmatprep.subr.mxu0 %v861_v0  ;;  %769 = vmatprep.subr.mxu1 %v861_v0 }
  0x4c   :  { %759 = vmatpush3.msra.mxu0 %v205_v44  ;;  %770 = vmatpush3.msra.mxu1 %v900_v6 }
  0x4d   :  { %760 = vmatprep.subr.mxu0 %v861_v0  ;;  %771 = vmatprep.subr.mxu1 %v861_v0 }
  0x4e   :  { %761 = vmatpush3.msra.mxu0 %v212_v48  ;;  %762 = vmatprep.mubr.msk.f32.mxu0 %vm862_vm0, %v861_v0 }
  0x4f   :  { %772 = vmatpush3.msra.mxu1 %v902_v10  ;;  %763 = vmatmul.mubr.f32.vlgmr.msra.gmra.mxu0 %v934_v27 }
  0x50   :  { %773 = vmatprep.subr.mxu1 %v861_v0  ;;  %781 = vmatprep.mubr.msk.f32.mxu1 %vm862_vm0, %v861_v0 }
  0x51   :  { %774 = vmatpush3.msra.mxu1 %v904_v11 }
  0x52   :  { %775 = vmatprep.subr.mxu1 %v861_v0 }
  0x53   :  { %776 = vmatpush3.msra.mxu1 %v906_v12 }
  0x54   :  { %777 = vmatprep.subr.mxu1 %v861_v0 }
  0x55   :  { %778 = vmatpush3.msra.mxu1 %v915_v18 }
  0x56   :  { %779 = vmatprep.subr.mxu1 %v861_v0 }
  0x57   :  { %780 = vmatpush3.msra.mxu1 %v921_v20 }
  0x58   :  { %782 = vmatmul.mubr.f32.vlgmr.msra.gmra.mxu1 %v934_v27 }
  0xed   :  { %v140_v56 = vpop.f32.mrf.mxu0 }
  0xee   :  { %v141_v2 = vadd.f32 %v615_v1, %v140_v56 }
  0xef   :  { %v688_v57 = vpop.f32.mrf.mxu0 }
  0xf4   :  { %v251_v58 = vpop.f32.mrf.mxu1 }
  0xf5   :  { %v252_v4 = vadd.f32 %v251_v58, %v141_v2 }
  0xf6   :  { %v707_v59 = vpop.f32.mrf.mxu1 }
  0xfd   :  { %v339_v60 = vpop.f32.mrf.mxu0 }
  0xfe   :  { %v340_v5 = vadd.f32 %v339_v60, %v252_v4 }
  0xff   :  { %v726_v61 = vpop.f32.mrf.mxu0 }
 0x106   :  { %v420_v62 = vpop.f32.mrf.mxu1 }
 0x107   :  { %v421_v6 = vadd.f32 %v420_v62, %v340_v5 }
 0x108   :  { %v745_v63 = vpop.f32.mrf.mxu1 }
 0x10f   :  { %v515_v3 = vpop.f32.mrf.mxu0 }
 0x110   :  { %v516_v7 = vadd.f32 %v515_v3, %v421_v6 }
 0x111   :  { %v764_v0 = vpop.f32.mrf.mxu0 }
 0x118   :  { %v594_v8 = vpop.f32.mrf.mxu1 }
 0x119   :  { %v595_v9 = vadd.f32 %v594_v8, %v516_v7 }
 0x11a   :  { %v783_v10 = vpop.f32.mrf.mxu1 }
 0x11b   :  { %598 = vst [vmem:[#allocation7] sm:$0xff] %v595_v9 }
 0x11c   :  { %842 = shalt.err (!%p839_p0)
}
 0x11d   :  { %608 = dma.vmem_to_hbm [thread:$0]  %s606_s25, 128, %s1095_s3, [#allocation4]  }
 0x11e   :  { %855 = dma.done.wait [#allocation4], 128  }
 0x11f   :  { %856 = vsyncadd [#allocation4], 4294967168 }
 0x120   :  { %612 = vsyncpa [#allocation3], 1 }
 0x121   :  { %613 = vsyncpa [#allocation6], 1 }
 0x122   :  { %614 = vsyncpa [#allocation4], 1 }

// kernel: tpu_custom_call.1
= control target key start
LH: loop header
LB: loop body
LE: loop exit
PB: predicated region body
PF: predicated region fallthrough
CT: control target
= control target key end

     0   :  { %8 = vsyncpa [#allocation3], 0  ;;  %s1092_s0 = inlined_call_operand.hbm [shape: f32[8,64], index: 0, kind: input, shape index: {}]   ;;  %s1093_s1 = inlined_call_operand.hbm [shape: f32[64,128], index: 1, kind: input, shape index: {}]   ;;  %s1094_s2 = inlined_call_operand.vmem [shape: f32[1,128], index: 2, kind: input, shape index: {}]   ;;  %s1095_s3 = inlined_call_operand.hbm [shape: f32[8,128], index: 3, kind: output, shape index: {}]  }
   0x1   :  { %9 = vsyncpa [#allocation6], 0 }
   0x2   :  { %10 = vsyncpa [#allocation4], 0  ;;  %s857_s12 = smov [#allocation2]   ;;  %s858_s14 = smov [#allocation5]  }
   0x3   :  { %s17_s13 = sshll.u32 %s857_s12, 4  ;;  %s26_s15 = sshll.u32 %s858_s14, 4  ;;  %s18_s13 = int_to_ptr.vmem [resolvable:$true] %s17_s13  ;;  %s27_s15 = int_to_ptr.vmem [resolvable:$true] %s26_s15 }
   0x4   :  { %s799_s16 = scalar_lea.vmem %s18_s13, 128  ;;  %p804_p1 = scmp.lt.s32.totalorder %s18_s13, %s18_s13 }
   0x5   :  { %p800_p0 = scmp.ne.s32.totalorder %s18_s13, %s799_s16  ;;  %p805_p2 = scmp.lt.s32.totalorder %s799_s16, %s799_s16 }
   0x7   :  { %p806_p3 = por %p805_p2, %p804_p1 }
   0x9   :  { %p807_p4 = pnand %p806_p3, %p800_p0 }
   0xb   :  { %810 = shalt.err (!%p807_p4)
}
   0xc   :  { %20 = dma.hbm_to_vmem [thread:$0]  %s1092_s0, 128, %s18_s13, [#allocation3]  }
   0xd   :  { %s819_s19 = scalar_lea.vmem %s27_s15, 1024  ;;  %p824_p6 = scmp.lt.s32.totalorder %s27_s15, %s27_s15 }
   0xe   :  { %p820_p5 = scmp.ne.s32.totalorder %s27_s15, %s819_s19  ;;  %p825_p7 = scmp.lt.s32.totalorder %s819_s19, %s819_s19 }
  0x10   :  { %p826_p8 = por %p825_p7, %p824_p6 }
  0x12   :  { %p827_p9 = pnand %p826_p8, %p820_p5 }
  0x14   :  { %830 = shalt.err (!%p827_p9)
}
  0x15   :  { %s859_s20 = smov 128   ;;  %s860_s21 = smov 8  }
  0x16   :  { %32 = dma.hbm_to_vmem [thread:$0]  %s1093_s1, 1024, %s27_s15, [#allocation6], %s859_s20, %s859_s20, %s860_s21  }
  0x17   :  { %851 = dma.done.wait [#allocation3], 128  }
  0x18   :  { %852 = vsyncadd [#allocation3], 4294967168 }
  0x19   :  { %853 = dma.done.wait [#allocation6], 1024  }
  0x1a   :  { %854 = vsyncadd [#allocation6], 4294966272  ;;  %v861_v0 = vmov 0.0   ;;  %vm862_vm0 = vmmov 0   ;;  %v49_v1 = vld [vmem:[#allocation5 + $0x38] sm:$0xff]  ;;  %v48_v2 = vld [vmem:[#allocation5 + $0x30] sm:$0xff] }
  0x1b   :  { %670 = vmatprep.subr.mxu0 %v861_v0  ;;  %689 = vmatprep.subr.mxu1 %v861_v0  ;;  %v47_v3 = vld [vmem:[#allocation5 + $0x28] sm:$0xff]  ;;  %vm57_vm1 = vcmask 523264   ;;  %v896_v4 = vand.u32 4294901760, %v49_v1  ;;  %v898_v5 = vand.u32 4294901760, %v48_v2  ;;  %v46_v7 = vld [vmem:[#allocation5 + $0x20] sm:$0xff]  ;;  %v45_v8 = vld [vmem:[#allocation5 + $0x18] sm:$0xff] }
  0x1c   :  { %686 = vmatprep.mubr.msk.f32.mxu0 %vm862_vm0, %v861_v0  ;;  %705 = vmatprep.mubr.msk.f32.mxu1 %vm862_vm0, %v861_v0  ;;  %v900_v6 = vand.u32 4294901760, %v47_v3  ;;  %v44_v9 = vld [vmem:[#allocation5 + $0x10] sm:$0xff]  ;;  %v902_v10 = vand.u32 4294901760, %v46_v7  ;;  %v904_v11 = vand.u32 4294901760, %v45_v8  ;;  %v43_v13 = vld [vmem:[#allocation5 + $0x8] sm:$0xff]  ;;  %v42_v14 = vld [vmem:[#allocation5] sm:$0xff] }
  0x1d   :  { %v906_v12 = vand.u32 4294901760, %v44_v9  ;;  %v41_v15 = vld [vmem:[#allocation2] sm:$0xff]  ;;  %671 = vmatpush3.msra.mxu0 %v896_v4  ;;  %v910_v16 = vsub.f32 %v49_v1, %v896_v4  ;;  %v913_v17 = vsub.f32 %v48_v2, %v898_v5  ;;  %v915_v18 = vand.u32 4294901760, %v43_v13  ;;  %s863_s24 = smov [#allocation7]  }
  0x1e   :  { %v918_v19 = vsub.f32 %v47_v3, %v900_v6  ;;  %672 = vmatprep.subr.mxu0 %v861_v0  ;;  %v921_v20 = vand.u32 4294901760, %v42_v14  ;;  %v924_v21 = vsub.f32 %v46_v7, %v902_v10  ;;  %v59_v22 = vsel %vm57_vm1, %v41_v15, 0  ;;  %v615_v1 = vld [vmem:[%s1094_s2] ss:$0 sm:$0xff]  ;;  %s605_s25 = sshll.u32 %s863_s24, 4  ;;  %s606_s25 = int_to_ptr.vmem [resolvable:$true] %s605_s25 }
  0x1f   :  { %v928_v23 = vsub.f32 %v45_v8, %v904_v11  ;;  %673 = vmatpush3.msra.mxu0 %v898_v5  ;;  %v163_v24 = vand.u32 4294901760, %v910_v16  ;;  %v170_v25 = vand.u32 4294901760, %v913_v17  ;;  %v934_v27 = vand.u32 4294901760, %v59_v22  ;;  %s831_s26 = scalar_lea.vmem %s606_s25, 128  ;;  %p836_p11 = scmp.lt.s32.totalorder %s606_s25, %s606_s25 }
  0x20   :  { %v177_v26 = vand.u32 4294901760, %v918_v19  ;;  %674 = vmatprep.subr.mxu0 %v861_v0  ;;  %v184_v28 = vand.u32 4294901760, %v924_v21  ;;  %v940_v30 = vsub.f32 %v44_v9, %v906_v12  ;;  %v943_v31 = vsub.f32 %v43_v13, %v915_v18  ;;  %p832_p10 = scmp.ne.s32.totalorder %s606_s25, %s831_s26  ;;  %p837_p12 = scmp.lt.s32.totalorder %s831_s26, %s831_s26 }
  0x21   :  { %v191_v29 = vand.u32 4294901760, %v928_v23  ;;  %675 = vmatpush3.msra.mxu0 %v900_v6  ;;  %v164_v32 = vsub.f32 %v910_v16, %v163_v24  ;;  %v171_v33 = vsub.f32 %v913_v17, %v170_v25  ;;  %v956_v35 = vsub.f32 %v59_v22, %v934_v27 }
  0x22   :  { %v178_v34 = vsub.f32 %v918_v19, %v177_v26  ;;  %676 = vmatprep.subr.mxu0 %v861_v0  ;;  %v185_v36 = vsub.f32 %v924_v21, %v184_v28  ;;  %v198_v40 = vand.u32 4294901760, %v940_v30  ;;  %v205_v44 = vand.u32 4294901760, %v943_v31  ;;  %p838_p13 = por %p837_p12, %p836_p11 }
  0x23   :  { %677 = vmatpush3.msra.mxu0 %v902_v10  ;;  %v165_v37 = vand.u32 4294901760, %v164_v32  ;;  %v172_v38 = vand.u32 4294901760, %v171_v33  ;;  %v136_v39 = vand.u32 4294901760, %v956_v35  ;;  %v192_v41 = vsub.f32 %v928_v23, %v191_v29 }
  0x24   :  { %678 = vmatprep.subr.mxu0 %v861_v0  ;;  %v179_v42 = vand.u32 4294901760, %v178_v34  ;;  %v975_v45 = vsub.f32 %v42_v14, %v921_v20  ;;  %v186_v46 = vand.u32 4294901760, %v185_v36  ;;  %v199_v47 = vsub.f32 %v940_v30, %v198_v40  ;;  %p839_p0 = pnand %p838_p13, %p832_p10 }
  0x25   :  { %679 = vmatpush3.msra.mxu0 %v904_v11  ;;  %690 = vmatpush3.msra.mxu1 %v165_v37  ;;  %v137_v43 = vsub.f32 %v956_v35, %v136_v39  ;;  %v193_v50 = vand.u32 4294901760, %v192_v41  ;;  %v206_v51 = vsub.f32 %v943_v31, %v205_v44 }
  0x26   :  { %680 = vmatprep.subr.mxu0 %v861_v0  ;;  %691 = vmatprep.subr.mxu1 %v861_v0  ;;  %v212_v48 = vand.u32 4294901760, %v975_v45  ;;  %v200_v52 = vand.u32 4294901760, %v199_v47 }
  0x27   :  { %681 = vmatpush3.msra.mxu0 %v906_v12  ;;  %692 = vmatpush3.msra.mxu1 %v172_v38  ;;  %v138_v49 = vand.u32 4294901760, %v137_v43  ;;  %v207_v54 = vand.u32 4294901760, %v206_v51 }
  0x28   :  { %682 = vmatprep.subr.mxu0 %v861_v0  ;;  %693 = vmatprep.subr.mxu1 %v861_v0  ;;  %v213_v53 = vsub.f32 %v975_v45, %v212_v48 }
  0x29   :  { %683 = vmatpush3.msra.mxu0 %v915_v18  ;;  %694 = vmatpush3.msra.mxu1 %v179_v42 }
  0x2a   :  { %684 = vmatprep.subr.mxu0 %v861_v0  ;;  %695 = vmatprep.subr.mxu1 %v861_v0  ;;  %v214_v55 = vand.u32 4294901760, %v213_v53 }
  0x2b   :  { %685 = vmatpush3.msra.mxu0 %v921_v20  ;;  %696 = vmatpush3.msra.mxu1 %v186_v46 }
  0x2c   :  { %697 = vmatprep.subr.mxu1 %v861_v0  ;;  %708 = vmatprep.subr.mxu0 %v861_v0 }
  0x2d   :  { %687 = vmatmul.mubr.f32.vlgmr.msra.gmra.mxu0 %v138_v49  ;;  %698 = vmatpush3.msra.mxu1 %v193_v50 }
  0x2e   :  { %709 = vmatpush3.msra.mxu0 %v910_v16  ;;  %699 = vmatprep.subr.mxu1 %v861_v0 }
  0x2f   :  { %710 = vmatprep.subr.mxu0 %v861_v0  ;;  %700 = vmatpush3.msra.mxu1 %v200_v52 }
  0x30   :  { %711 = vmatpush3.msra.mxu0 %v913_v17  ;;  %701 = vmatprep.subr.mxu1 %v861_v0 }
  0x31   :  { %712 = vmatprep.subr.mxu0 %v861_v0  ;;  %702 = vmatpush3.msra.mxu1 %v207_v54 }
  0x32   :  { %713 = vmatpush3.msra.mxu0 %v918_v19  ;;  %703 = vmatprep.subr.mxu1 %v861_v0 }
  0x33   :  { %714 = vmatprep.subr.mxu0 %v861_v0  ;;  %704 = vmatpush3.msra.mxu1 %v214_v55 }
  0x34   :  { %715 = vmatpush3.msra.mxu0 %v924_v21  ;;  %706 = vmatmul.mubr.f32.vlgmr.msra.gmra.mxu1 %v934_v27 }
  0x35   :  { %716 = vmatprep.subr.mxu0 %v861_v0  ;;  %727 = vmatprep.subr.mxu1 %v861_v0 }
  0x36   :  { %717 = vmatpush3.msra.mxu0 %v928_v23  ;;  %728 = vmatpush3.msra.mxu1 %v896_v4 }
  0x37   :  { %718 = vmatprep.subr.mxu0 %v861_v0  ;;  %729 = vmatprep.subr.mxu1 %v861_v0 }
  0x38   :  { %719 = vmatpush3.msra.mxu0 %v940_v30  ;;  %730 = vmatpush3.msra.mxu1 %v898_v5 }
  0x39   :  { %720 = vmatprep.subr.mxu0 %v861_v0  ;;  %731 = vmatprep.subr.mxu1 %v861_v0 }
  0x3a   :  { %721 = vmatpush3.msra.mxu0 %v943_v31  ;;  %732 = vmatpush3.msra.mxu1 %v900_v6 }
  0x3b   :  { %722 = vmatprep.subr.mxu0 %v861_v0  ;;  %733 = vmatprep.subr.mxu1 %v861_v0 }
  0x3c   :  { %723 = vmatpush3.msra.mxu0 %v975_v45  ;;  %724 = vmatprep.mubr.msk.f32.mxu0 %vm862_vm0, %v861_v0 }
  0x3d   :  { %734 = vmatpush3.msra.mxu1 %v902_v10  ;;  %725 = vmatmul.mubr.f32.vlgmr.msra.gmra.mxu0 %v956_v35 }
  0x3e   :  { %735 = vmatprep.subr.mxu1 %v861_v0  ;;  %746 = vmatprep.subr.mxu0 %v861_v0 }
  0x3f   :  { %736 = vmatpush3.msra.mxu1 %v904_v11  ;;  %747 = vmatpush3.msra.mxu0 %v163_v24 }
  0x40   :  { %737 = vmatprep.subr.mxu1 %v861_v0  ;;  %748 = vmatprep.subr.mxu0 %v861_v0 }
  0x41   :  { %738 = vmatpush3.msra.mxu1 %v906_v12  ;;  %749 = vmatpush3.msra.mxu0 %v170_v25 }
  0x42   :  { %739 = vmatprep.subr.mxu1 %v861_v0  ;;  %750 = vmatprep.subr.mxu0 %v861_v0 }
  0x43   :  { %740 = vmatpush3.msra.mxu1 %v915_v18  ;;  %751 = vmatpush3.msra.mxu0 %v177_v26 }
  0x44   :  { %741 = vmatprep.subr.mxu1 %v861_v0  ;;  %752 = vmatprep.subr.mxu0 %v861_v0 }
  0x45   :  { %742 = vmatpush3.msra.mxu1 %v921_v20  ;;  %743 = vmatprep.mubr.msk.f32.mxu1 %vm862_vm0, %v861_v0 }
  0x46   :  { %753 = vmatpush3.msra.mxu0 %v184_v28  ;;  %744 = vmatmul.mubr.f32.vlgmr.msra.gmra.mxu1 %v136_v39 }
  0x47   :  { %754 = vmatprep.subr.mxu0 %v861_v0  ;;  %765 = vmatprep.subr.mxu1 %v861_v0 }
  0x48   :  { %755 = vmatpush3.msra.mxu0 %v191_v29  ;;  %766 = vmatpush3.msra.mxu1 %v896_v4 }
  0x49   :  { %756 = vmatprep.subr.mxu0 %v861_v0  ;;  %767 = vmatprep.subr.mxu1 %v861_v0 }
  0x4a   :  { %757 = vmatpush3.msra.mxu0 %v198_v40  ;;  %768 = vmatpush3.msra.mxu1 %v898_v5 }
  0x4b   :  { %758 = vmatprep.subr.mxu0 %v861_v0  ;;  %769 = vmatprep.subr.mxu1 %v861_v0 }
  0x4c   :  { %759 = vmatpush3.msra.mxu0 %v205_v44  ;;  %770 = vmatpush3.msra.mxu1 %v900_v6 }
  0x4d   :  { %760 = vmatprep.subr.mxu0 %v861_v0  ;;  %771 = vmatprep.subr.mxu1 %v861_v0 }
  0x4e   :  { %761 = vmatpush3.msra.mxu0 %v212_v48  ;;  %762 = vmatprep.mubr.msk.f32.mxu0 %vm862_vm0, %v861_v0 }
  0x4f   :  { %772 = vmatpush3.msra.mxu1 %v902_v10  ;;  %763 = vmatmul.mubr.f32.vlgmr.msra.gmra.mxu0 %v934_v27 }
  0x50   :  { %773 = vmatprep.subr.mxu1 %v861_v0  ;;  %781 = vmatprep.mubr.msk.f32.mxu1 %vm862_vm0, %v861_v0 }
  0x51   :  { %774 = vmatpush3.msra.mxu1 %v904_v11 }
  0x52   :  { %775 = vmatprep.subr.mxu1 %v861_v0 }
  0x53   :  { %776 = vmatpush3.msra.mxu1 %v906_v12 }
  0x54   :  { %777 = vmatprep.subr.mxu1 %v861_v0 }
  0x55   :  { %778 = vmatpush3.msra.mxu1 %v915_v18 }
  0x56   :  { %779 = vmatprep.subr.mxu1 %v861_v0 }
  0x57   :  { %780 = vmatpush3.msra.mxu1 %v921_v20 }
  0x58   :  { %782 = vmatmul.mubr.f32.vlgmr.msra.gmra.mxu1 %v934_v27 }
  0xed   :  { %v140_v56 = vpop.f32.mrf.mxu0 }
  0xee   :  { %v141_v2 = vadd.f32 %v615_v1, %v140_v56 }
  0xef   :  { %v688_v57 = vpop.f32.mrf.mxu0 }
  0xf4   :  { %v251_v58 = vpop.f32.mrf.mxu1 }
  0xf5   :  { %v252_v4 = vadd.f32 %v251_v58, %v141_v2 }
  0xf6   :  { %v707_v59 = vpop.f32.mrf.mxu1 }
  0xfd   :  { %v339_v60 = vpop.f32.mrf.mxu0 }
  0xfe   :  { %v340_v5 = vadd.f32 %v339_v60, %v252_v4 }
  0xff   :  { %v726_v61 = vpop.f32.mrf.mxu0 }
 0x106   :  { %v420_v62 = vpop.f32.mrf.mxu1 }
 0x107   :  { %v421_v6 = vadd.f32 %v420_v62, %v340_v5 }
 0x108   :  { %v745_v63 = vpop.f32.mrf.mxu1 }
 0x10f   :  { %v515_v3 = vpop.f32.mrf.mxu0 }
 0x110   :  { %v516_v7 = vadd.f32 %v515_v3, %v421_v6 }
 0x111   :  { %v764_v0 = vpop.f32.mrf.mxu0 }
 0x118   :  { %v594_v8 = vpop.f32.mrf.mxu1 }
 0x119   :  { %v595_v9 = vadd.f32 %v594_v8, %v516_v7 }
 0x11a   :  { %v783_v10 = vpop.f32.mrf.mxu1 }
 0x11b   :  { %598 = vst [vmem:[#allocation7] sm:$0xff] %v595_v9 }
 0x11c   :  { %842 = shalt.err (!%p839_p0)
}
 0x11d   :  { %608 = dma.vmem_to_hbm [thread:$0]  %s606_s25, 128, %s1095_s3, [#allocation4]  }
 0x11e   :  { %855 = dma.done.wait [#allocation4], 128  }
 0x11f   :  { %856 = vsyncadd [#allocation4], 4294967168 }
 0x120   :  { %612 = vsyncpa [#allocation3], 1 }
 0x121   :  { %613 = vsyncpa [#allocation6], 1 }
 0x122   :  { %614 = vsyncpa [#allocation4], 1 }

</bundles_post_ra>
